<compile_context>
chip_gen: v7x
topology: tpu7x:2x2x1
jax: 0.10.0
libtpu: 0.0.40
codegen_flags: <defaults>
</compile_context>

<pallas_src>
import functools

import jax
import jax.numpy as jnp
from jax.experimental import pallas as pl
from jax.experimental.pallas import tpu as pltpu


def _round_up(v, m):
    return ((v + m - 1) // m) * m


def _vmem_block_bytes(rows, cols, itemsize):
    # Native VMEM tiling pads the last dim to 128 lanes, second-to-last to 8.
    return _round_up(max(rows, 1), 8) * _round_up(max(cols, 1), 128) * itemsize


def _vmem_ceiling_bytes():
    # Physical per-core VMEM (v5e/v6e: 128 MiB, v7x: 64 MiB); conservative
    # 64 MiB fallback if the query is unavailable.
    try:
        cap = int(pltpu.get_tpu_info().vmem_capacity_bytes)
    except Exception:
        cap = 64 * 1024 * 1024
    return max(48 * 1024 * 1024, min(int(0.75 * cap), 100 * 1024 * 1024))


def edge_learning_kernel(eidx_ref, eattr_ref, tab_ref, we_ref, be_ref,
                         wf_ref, bf_ref, out_ref):
    """One tile of edges: gather-sum node branches, edge branch, final proj."""
    dt = tab_ref.dtype                       # matmul operand dtype (bf16/f32)
    te = eidx_ref.shape[0]                   # edge rows in this tile
    tn = tab_ref.shape[0]                    # 2 * padded node count

    # One-hot gather of the two (already ReLU'd) endpoint-node branch
    # activations.  eidx column 1 is pre-offset into the second half of the
    # node table, so a single [te, tn] one-hot with two hot lanes per row both
    # gathers AND sums the i- and j-branches in one MXU pass.
    idx = eidx_ref[...]                                           # [te, 2] i32
    cols = jax.lax.broadcasted_iota(jnp.int32, (te, tn), 1)
    onehot = ((cols == idx[:, 0:1]).astype(dt) +
              (cols == idx[:, 1:2]).astype(dt))                   # [te, tn]
    h_nodes = jnp.dot(onehot, tab_ref[...],
                      preferred_element_type=jnp.float32)         # [te, hp] f32

    # Edge-feature branch: h_e = ReLU(edge_attr @ We + be); f32 bias + ReLU on
    # the VPU, cast of the streamed f32 edge_attr to the matmul dtype is free.
    h_e = jnp.dot(eattr_ref[...].astype(dt), we_ref[...],
                  preferred_element_type=jnp.float32)
    h_e = jnp.maximum(h_e + be_ref[...], 0.0)

    # Reference: mask = ReLU(h_i + h_j + h_e).  All three terms are already
    # >= 0, so the inner ReLU is a mathematical no-op and is dropped.
    mask = h_nodes + h_e

    out = jnp.dot(mask.astype(dt), wf_ref[...],
                  preferred_element_type=jnp.float32)
    out_ref[...] = jnp.maximum(out + bf_ref[...], 0.0).astype(out_ref.dtype)


@functools.partial(jax.jit,
                   static_argnames=("compute_dtype", "out_dtype", "tile_e"))
def edge_learning(x, edge_index, edge_attr, params, *,
                  compute_dtype=jnp.bfloat16, out_dtype=jnp.float32,
                  tile_e=None):
    """Forward pass of EdgeLearning with ReLU activation.

    x          : [N, dim_node] f32 node features
    edge_index : [2, E] int32 (row 0: i endpoints, row 1: j endpoints)
    edge_attr  : [E, dim_edge] f32 edge features
    params     : dict of (already-transposed) weights [in,out] / biases [1,out]
    returns    : [E, out_dim] in `out_dtype`
    """
    E, dim_edge = edge_attr.shape
    N = x.shape[0]
    out_dim = params["w"].shape[1]

    n_pad = _round_up(max(N, 8), 8)          # node rows, sublane aligned
    hp = _round_up(out_dim, 128)             # lane-aligned branch/hidden width
    f32 = jnp.float32
    c_item = jnp.dtype(compute_dtype).itemsize
    o_item = jnp.dtype(out_dtype).itemsize

    # ---- tile size ----------------------------------------------------------
    if tile_e is None:
        if E <= 4096:
            tile_e = E                       # single block (equals full dim)
        else:
            # Big tiles (DMA-limited rather than per-step-overhead-limited)
            # and an even grid length >= 4 so both v7x TCs stay pipelined.
            n_steps = max(4, _round_up(pl.cdiv(E, 4096), 2))
            tile_e = _round_up(pl.cdiv(E, n_steps), 16)
    elif tile_e < E:
        tile_e = _round_up(max(tile_e, 16), 16)   # sublane/bf16-pack friendly
    else:
        tile_e = E

    # ---- wrapper-side prep (O(N) node work + layout plumbing only) ----------
    # Exact algebraic hoist: fc_i / fc_j act on node features, so apply them
    # once per node instead of once per edge; the kernel gathers the ReLU'd
    # results per edge.  No E-sized tensor is materialized in the wrapper.
    hx_i = jnp.maximum(x @ params["wi"] + params["bi"], 0.0)      # [N, out_dim]
    hx_j = jnp.maximum(x @ params["wj"] + params["bj"], 0.0)      # [N, out_dim]
    tab = jnp.zeros((2 * n_pad, hp), f32)
    tab = tab.at[:N, :out_dim].set(hx_i)
    tab = tab.at[n_pad:n_pad + N, :out_dim].set(hx_j)
    tab = tab.astype(compute_dtype)

    # Edge indices, [E, 2] int32; column 1 pre-offset into the j-half of tab.
    eidx = jnp.stack(
        [edge_index[0, :], edge_index[1, :] + n_pad], axis=1).astype(jnp.int32)

    # Edge-branch weight: columns zero-padded to the lane-aligned width hp.
    # Padded lanes stay exactly 0 through bias+ReLU, so wf's padded rows are
    # inert (zeros) and the math is unchanged.
    we_p = jnp.zeros((dim_edge, hp), f32).at[:, :out_dim].set(
        params["we"]).astype(compute_dtype)
    be_p = jnp.zeros((1, hp), f32).at[:, :out_dim].set(params["be"])
    wf_p = jnp.zeros((hp, out_dim), f32).at[:out_dim, :].set(
        params["w"]).astype(compute_dtype)
    bf = params["b"].astype(f32)

    # ---- VMEM budget: double-buffered streams + resident weights + live
    #      intermediates, capped by the physical per-core budget --------------
    streams = 2 * (_vmem_block_bytes(tile_e, 2, 4)
                   + _vmem_block_bytes(tile_e, dim_edge, 4)
                   + _vmem_block_bytes(tile_e, out_dim, o_item))
    weights = 2 * (_vmem_block_bytes(2 * n_pad, hp, c_item)
                   + _vmem_block_bytes(dim_edge, hp, c_item)
                   + _vmem_block_bytes(1, hp, 4)
                   + _vmem_block_bytes(hp, out_dim, c_item)
                   + _vmem_block_bytes(1, out_dim, 4))
    inter = (_vmem_block_bytes(tile_e, 2 * n_pad, c_item)         # one-hot
             + 3 * _vmem_block_bytes(tile_e, hp, 4)               # h_nodes/h_e/mask
             + _vmem_block_bytes(tile_e, hp, c_item)              # mask cast
             + _vmem_block_bytes(tile_e, out_dim, 4))             # pre-cast out
    vmem_needed = streams + weights + inter
    vmem_limit = int(min(max(32 * 1024 * 1024, vmem_needed + 8 * 1024 * 1024),
                         _vmem_ceiling_bytes()))

    flops = (2 * E * (2 * n_pad) * hp
             + 2 * E * dim_edge * hp
             + 2 * E * hp * out_dim)
    bytes_accessed = (E * (8 + dim_edge * 4 + out_dim * o_item)
                      + (2 * n_pad * hp + dim_edge * hp + hp * out_dim) * c_item
                      + (hp + out_dim) * 4)

    def resident(shape):
        # Constant index map: fetched once, re-used on every grid step.
        return pl.BlockSpec(shape, lambda i: (0, 0))

    out = pl.pallas_call(
        edge_learning_kernel,
        out_shape=jax.ShapeDtypeStruct((E, out_dim), out_dtype),
        grid_spec=pltpu.PrefetchScalarGridSpec(
            num_scalar_prefetch=0,
            grid=(pl.cdiv(E, tile_e),),
            in_specs=[
                pl.BlockSpec((tile_e, 2), lambda i: (i, 0)),          # eidx
                pl.BlockSpec((tile_e, dim_edge), lambda i: (i, 0)),   # edge_attr
                resident((2 * n_pad, hp)),                            # node table
                resident((dim_edge, hp)),                             # We
                resident((1, hp)),                                    # be
                resident((hp, out_dim)),                              # W
                resident((1, out_dim)),                               # b
            ],
            out_specs=pl.BlockSpec((tile_e, out_dim), lambda i: (i, 0)),
        ),
        compiler_params=pltpu.CompilerParams(
            dimension_semantics=("parallel",),
            vmem_limit_bytes=vmem_limit,
        ),
        cost_estimate=pl.CostEstimate(
            flops=flops, transcendentals=0, bytes_accessed=bytes_accessed),
    )(eidx, edge_attr, tab, we_p, be_p, wf_p, bf)
    return out


def init_params(key, dim_node, dim_edge, out_dim):
    """Deterministic parameter init (weights stored as [in_dim, out_dim])."""
    ks = jax.random.split(key, 8)

    def lin(kw, kb, fan_in, fan_out):
        bound = 1.0 / jnp.sqrt(fan_in)
        w = jax.random.uniform(kw, (fan_in, fan_out), jnp.float32, -bound, bound)
        b = jax.random.uniform(kb, (1, fan_out), jnp.float32, -bound, bound)
        return w, b

    wi, bi = lin(ks[0], ks[1], dim_node, out_dim)
    wj, bj = lin(ks[2], ks[3], dim_node, out_dim)
    we, be = lin(ks[4], ks[5], dim_edge, out_dim)
    w, b = lin(ks[6], ks[7], out_dim, out_dim)
    return dict(wi=wi, bi=bi, wj=wj, bj=bj, we=we, be=be, w=w, b=b)


def edge_learning_ref(x, edge_index, edge_attr, params):
    """Pure-JAX reference mirroring the PyTorch forward (ReLU activation)."""
    x_i = jnp.maximum(x[edge_index[0, :]] @ params["wi"] + params["bi"], 0.0)
    x_j = jnp.maximum(x[edge_index[1, :]] @ params["wj"] + params["bj"], 0.0)
    ea = jnp.maximum(edge_attr @ params["we"] + params["be"], 0.0)
    mask = jnp.maximum(x_i + x_j + ea, 0.0)
    return jnp.maximum(mask @ params["w"] + params["b"], 0.0)


if __name__ == "__main__":
    # Small, forward-consistent shapes.
    num_nodes = 8
    num_edges = 40          # not a multiple of the explicit tile below
    dim_node = 32
    dim_edge = 16
    out_dim = 32

    key = jax.random.PRNGKey(0)
    k_x, k_e, k_idx, k_p = jax.random.split(key, 4)

    x = jax.random.normal(k_x, (num_nodes, dim_node), jnp.float32)
    edge_attr = jax.random.normal(k_e, (num_edges, dim_edge), jnp.float32)
    edge_index = jax.random.randint(k_idx, (2, num_edges), 0, num_nodes, jnp.int32)
    params = init_params(k_p, dim_node, dim_edge, out_dim)

    ref = edge_learning_ref(x, edge_index, edge_attr, params)

    # Fast path: bf16 matmul operands, auto tile (single block here), f32 out.
    out_bf16 = jax.block_until_ready(edge_learning(x, edge_index, edge_attr, params))
    assert out_bf16.shape == (num_edges, out_dim)
    assert jnp.allclose(out_bf16, ref, atol=1e-1, rtol=1e-1)      # bf16 tolerance

    # Exact path: f32 operands, explicit tile -> multi-step grid + partial tile.
    out_f32 = jax.block_until_ready(
        edge_learning(x, edge_index, edge_attr, params,
                      compute_dtype=jnp.float32, tile_e=16))
    assert out_f32.shape == (num_edges, out_dim)
    assert jnp.allclose(out_f32, ref, atol=2e-4, rtol=2e-4)

    # Lowest-HBM path: bf16 operands and bf16 output (cast in the consumer).
    out_lo = jax.block_until_ready(
        edge_learning(x, edge_index, edge_attr, params, out_dtype=jnp.bfloat16))
    assert out_lo.dtype == jnp.bfloat16 and out_lo.shape == (num_edges, out_dim)
    assert jnp.allclose(out_lo.astype(jnp.float32), ref, atol=1e-1, rtol=1e-1)

    print("KERNEL_OK")
</pallas_src>

<mosaic_0001>
module attributes {stable_mosaic.version = 11 : i64} {
  func.func @edge_learning_kernel(%arg0: i32, %arg1: memref<40x2xi32, #tpu.memory_space<vmem>>, %arg2: memref<40x16xf32, #tpu.memory_space<vmem>>, %arg3: memref<16x128xbf16, #tpu.memory_space<vmem>>, %arg4: memref<16x128xbf16, #tpu.memory_space<vmem>>, %arg5: memref<1x128xf32, #tpu.memory_space<vmem>>, %arg6: memref<128x32xbf16, #tpu.memory_space<vmem>>, %arg7: memref<1x32xf32, #tpu.memory_space<vmem>>, %arg8: memref<40x32xf32, #tpu.memory_space<vmem>>) attributes {dimension_semantics = [#tpu.dimension_semantics<parallel>], iteration_bounds = array<i64: 1>, scalar_prefetch = 0 : i64, scratch_operands = 0 : i64, tpu.core_type = #tpu.core_type<tc>, window_params = [{transform_indices = @transform_0, window_bounds = array<i64: 40, 2>}, {transform_indices = @transform_1, window_bounds = array<i64: 40, 16>}, {pipeline_mode = #tpu.pipeline_mode<synchronous>, transform_indices = @transform_2, window_bounds = array<i64: 16, 128>}, {pipeline_mode = #tpu.pipeline_mode<synchronous>, transform_indices = @transform_3, window_bounds = array<i64: 16, 128>}, {pipeline_mode = #tpu.pipeline_mode<synchronous>, transform_indices = @transform_4, window_bounds = array<i64: 1, 128>}, {pipeline_mode = #tpu.pipeline_mode<synchronous>, transform_indices = @transform_5, window_bounds = array<i64: 128, 32>}, {pipeline_mode = #tpu.pipeline_mode<synchronous>, transform_indices = @transform_6, window_bounds = array<i64: 1, 32>}, {transform_indices = @transform_7, window_bounds = array<i64: 40, 32>}]} {
    %c0 = arith.constant 0 : index
    %c0_0 = arith.constant 0 : index
    %0 = vector.load %arg1[%c0, %c0_0] : memref<40x2xi32, #tpu.memory_space<vmem>>, vector<40x2xi32>
    %1 = tpu.iota {dimensions = array<i32: 1>} : vector<40x16xi32>
    %2 = vector.extract_strided_slice %0 {offsets = [0, 0], sizes = [40, 1], strides = [1, 1]} : vector<40x2xi32> to vector<40x1xi32>
    %3 = vector.broadcast %2 : vector<40x1xi32> to vector<40x16xi32>
    %4 = arith.cmpi eq, %1, %3 : vector<40x16xi32>
    %5 = arith.extui %4 : vector<40x16xi1> to vector<40x16xi32>
    %6 = arith.sitofp %5 : vector<40x16xi32> to vector<40x16xf32>
    %7 = arith.truncf %6 : vector<40x16xf32> to vector<40x16xbf16>
    %8 = vector.extract_strided_slice %0 {offsets = [0, 1], sizes = [40, 1], strides = [1, 1]} : vector<40x2xi32> to vector<40x1xi32>
    %9 = vector.broadcast %8 : vector<40x1xi32> to vector<40x16xi32>
    %10 = arith.cmpi eq, %1, %9 : vector<40x16xi32>
    %11 = arith.extui %10 : vector<40x16xi1> to vector<40x16xi32>
    %12 = arith.sitofp %11 : vector<40x16xi32> to vector<40x16xf32>
    %13 = arith.truncf %12 : vector<40x16xf32> to vector<40x16xbf16>
    %14 = arith.addf %7, %13 : vector<40x16xbf16>
    %c0_1 = arith.constant 0 : index
    %c0_2 = arith.constant 0 : index
    %15 = vector.load %arg3[%c0_1, %c0_2] : memref<16x128xbf16, #tpu.memory_space<vmem>>, vector<16x128xbf16>
    %cst = arith.constant dense<0.000000e+00> : vector<40x128xf32>
    %16 = tpu.matmul %14, %15, %cst {dimension_numbers = #tpu.dot_dimension_numbers<[1], [0], [0], [1], [0, 0, 1, 1], [], []>} : vector<40x16xbf16>, vector<16x128xbf16>, vector<40x128xf32> -> vector<40x128xf32>
    %c0_3 = arith.constant 0 : index
    %c0_4 = arith.constant 0 : index
    %17 = vector.load %arg2[%c0_3, %c0_4] : memref<40x16xf32, #tpu.memory_space<vmem>>, vector<40x16xf32>
    %18 = arith.truncf %17 : vector<40x16xf32> to vector<40x16xbf16>
    %c0_5 = arith.constant 0 : index
    %c0_6 = arith.constant 0 : index
    %19 = vector.load %arg4[%c0_5, %c0_6] : memref<16x128xbf16, #tpu.memory_space<vmem>>, vector<16x128xbf16>
    %cst_7 = arith.constant dense<0.000000e+00> : vector<40x128xf32>
    %20 = tpu.matmul %18, %19, %cst_7 {dimension_numbers = #tpu.dot_dimension_numbers<[1], [0], [0], [1], [0, 0, 1, 1], [], []>} : vector<40x16xbf16>, vector<16x128xbf16>, vector<40x128xf32> -> vector<40x128xf32>
    %c0_8 = arith.constant 0 : index
    %c0_9 = arith.constant 0 : index
    %21 = vector.load %arg5[%c0_8, %c0_9] : memref<1x128xf32, #tpu.memory_space<vmem>>, vector<1x128xf32>
    %22 = vector.broadcast %21 : vector<1x128xf32> to vector<40x128xf32>
    %23 = arith.addf %20, %22 : vector<40x128xf32>
    %cst_10 = arith.constant 0.000000e+00 : f32
    %24 = vector.broadcast %cst_10 : f32 to vector<40x128xf32>
    %25 = arith.maximumf %23, %24 : vector<40x128xf32>
    %26 = arith.addf %16, %25 : vector<40x128xf32>
    %27 = arith.truncf %26 : vector<40x128xf32> to vector<40x128xbf16>
    %c0_11 = arith.constant 0 : index
    %c0_12 = arith.constant 0 : index
    %28 = vector.load %arg6[%c0_11, %c0_12] : memref<128x32xbf16, #tpu.memory_space<vmem>>, vector<128x32xbf16>
    %cst_13 = arith.constant dense<0.000000e+00> : vector<40x32xf32>
    %29 = tpu.matmul %27, %28, %cst_13 {dimension_numbers = #tpu.dot_dimension_numbers<[1], [0], [0], [1], [0, 0, 1, 1], [], []>} : vector<40x128xbf16>, vector<128x32xbf16>, vector<40x32xf32> -> vector<40x32xf32>
    %c0_14 = arith.constant 0 : index
    %c0_15 = arith.constant 0 : index
    %30 = vector.load %arg7[%c0_14, %c0_15] : memref<1x32xf32, #tpu.memory_space<vmem>>, vector<1x32xf32>
    %31 = vector.broadcast %30 : vector<1x32xf32> to vector<40x32xf32>
    %32 = arith.addf %29, %31 : vector<40x32xf32>
    %cst_16 = arith.constant 0.000000e+00 : f32
    %33 = vector.broadcast %cst_16 : f32 to vector<40x32xf32>
    %34 = arith.maximumf %32, %33 : vector<40x32xf32>
    %c0_17 = arith.constant 0 : index
    %c0_18 = arith.constant 0 : index
    %35 = vector.load %arg8[%c0_17, %c0_18] : memref<40x32xf32, #tpu.memory_space<vmem>>, vector<40x32xf32>
    tpu.vector_store %arg8[%c0_17, %c0_18], %34 {strides = array<i32>} : memref<40x32xf32, #tpu.memory_space<vmem>>, vector<40x32xf32>,
    return
  }
  func.func @transform_0(%arg0: i32) -> (i32, i32) {
    %c0_i32 = arith.constant 0 : i32
    %c0_i32_0 = arith.constant 0 : i32
    return %arg0, %c0_i32 : i32, i32
  }
  func.func @transform_1(%arg0: i32) -> (i32, i32) {
    %c0_i32 = arith.constant 0 : i32
    %c0_i32_0 = arith.constant 0 : i32
    return %arg0, %c0_i32 : i32, i32
  }
  func.func @transform_2(%arg0: i32) -> (i32, i32) {
    %c0_i32 = arith.constant 0 : i32
    %c0_i32_0 = arith.constant 0 : i32
    %c0_i32_1 = arith.constant 0 : i32
    return %c0_i32, %c0_i32_0 : i32, i32
  }
  func.func @transform_3(%arg0: i32) -> (i32, i32) {
    %c0_i32 = arith.constant 0 : i32
    %c0_i32_0 = arith.constant 0 : i32
    %c0_i32_1 = arith.constant 0 : i32
    return %c0_i32, %c0_i32_0 : i32, i32
  }
  func.func @transform_4(%arg0: i32) -> (i32, i32) {
    %c0_i32 = arith.constant 0 : i32
    %c0_i32_0 = arith.constant 0 : i32
    %c0_i32_1 = arith.constant 0 : i32
    return %c0_i32, %c0_i32_0 : i32, i32
  }
  func.func @transform_5(%arg0: i32) -> (i32, i32) {
    %c0_i32 = arith.constant 0 : i32
    %c0_i32_0 = arith.constant 0 : i32
    %c0_i32_1 = arith.constant 0 : i32
    return %c0_i32, %c0_i32_0 : i32, i32
  }
  func.func @transform_6(%arg0: i32) -> (i32, i32) {
    %c0_i32 = arith.constant 0 : i32
    %c0_i32_0 = arith.constant 0 : i32
    %c0_i32_1 = arith.constant 0 : i32
    return %c0_i32, %c0_i32_0 : i32, i32
  }
  func.func @transform_7(%arg0: i32) -> (i32, i32) {
    %c0_i32 = arith.constant 0 : i32
    %c0_i32_0 = arith.constant 0 : i32
    return %arg0, %c0_i32 : i32, i32
  }
}

</mosaic_0001>

<bundles_post_ra>
// kernel: edge_learning.1
= control target key start
LH: loop header
LB: loop body
LE: loop exit
PB: predicated region body
PF: predicated region fallthrough
CT: control target
= control target key end

     0   :  { %v554_v0 = vmov 1   ;;  %v555_v1 = vmov 0   ;;  %v556_v4 = vmov 0.0   ;;  %vm128_vm0 = vcmask 130048   ;;  %s736_s0 = inlined_call_operand.vmem [shape: s32[40,2], index: 0, kind: input, shape index: {}]   ;;  %s737_s3 = inlined_call_operand.vmem [shape: bf16[16,128], index: 3, kind: input, shape index: {}]   ;;  %s738_s1 = inlined_call_operand.vmem [shape: f32[40,16], index: 1, kind: input, shape index: {}]   ;;  %s739_s2 = inlined_call_operand.vmem [shape: bf16[16,128], index: 2, kind: input, shape index: {}]   ;;  %s740_s5 = inlined_call_operand.vmem [shape: bf16[128,32], index: 5, kind: input, shape index: {}]   ;;  %s741_s4 = inlined_call_operand.vmem [shape: f32[1,128], index: 4, kind: input, shape index: {}]   ;;  %s742_s6 = inlined_call_operand.vmem [shape: f32[1,32], index: 6, kind: input, shape index: {}]   ;;  %s743_s7 = inlined_call_operand.vmem [shape: f32[40,32], index: 7, kind: output, shape index: {}]  }
   0x1   :  { %539 = vset.pattern.permute.xlu1 %v554_v0  ;;  %538 = vset.pattern.permute.xlu0 %v555_v1  ;;  %v27_v2 = vld [vmem:[%s736_s0] sm:$0xff]  ;;  %v28_v3 = vld [vmem:[%s736_s0 + $0x8] sm:$0xff]  ;;  %v29_v9 = vld [vmem:[%s736_s0 + $0x10] sm:$0xff]  ;;  %vm557_vm1 = vmmov 0   ;;  %v32_v24 = vlaneseq  ;;  %vm405_vm12 = vcmask 261120  }
   0x2   :  { %68 = vperm.xlu1 %539, %v27_v2   ;;  %35 = vperm.xlu0 %538, %v27_v2   ;;  %v544_v5 = vld [vmem:[%s737_s3] sm:$0xff]   ;;  %v106_v7 = vld [vmem:[%s738_s1 + $0x8] sm:$0xff]  ;;  %v30_v11 = vld [vmem:[%s736_s0 + $0x18] sm:$0xff] }
   0x3   :  { %462 = vmatprep.subr.bf16.mxu0 %v556_v4  ;;  %476 = vmatprep.subr.bf16.mxu1 %v556_v4  ;;  %v105_v6 = vld [vmem:[%s738_s1] sm:$0xff]  ;;  %v107_v12 = vld [vmem:[%s738_s1 + $0x10] sm:$0xff]  ;;  %v108_v13 = vld [vmem:[%s738_s1 + $0x18] sm:$0xff]  ;;  %v33_v25 = vand.u32 127, %v32_v24 }
   0x4   :  { %463 = vmatpush3.bf16.msra.mxu0 %v544_v5  ;;  %v110_v8 = vpack.c.bf16 %v106_v7, %v105_v6  ;;  %464 = vmatprep.mubr.msk.bf16.mxu0 %vm557_vm1, %v556_v4  ;;  %v545_v10 = vld [vmem:[%s739_s2] sm:$0xff]   ;;  %v111_v14 = vpack.c.bf16 %v108_v13, %v107_v12  ;;  %v547_v19 = vld [vmem:[%s740_s5 + $0x8] sm:$0xff]   ;;  %v548_v20 = vld [vmem:[%s740_s5 + $0x10] sm:$0xff]  }
   0x5   :  { %478 = vmatprep.mubr.msk.bf16.mxu1 %vm557_vm1, %v556_v4  ;;  %490 = vmatprep.subr.bf16.mxu0 %v556_v4  ;;  %v31_v15 = vld [vmem:[%s736_s0 + $0x20] sm:$0xff]  ;;  %v549_v21 = vld [vmem:[%s740_s5 + $0x18] sm:$0xff]   ;;  %v551_v23 = vld [vmem:[%s740_s5 + $0x28] sm:$0xff]  }
   0x6   :  { %71 = vperm.xlu1 %539, %v28_v3   ;;  %38 = vperm.xlu0 %538, %v28_v3   ;;  %v109_v16 = vld [vmem:[%s738_s1 + $0x20] sm:$0xff]  ;;  %v552_v58 = vld [vmem:[%s740_s5 + $0x30] sm:$0xff]   ;;  %v553_v60 = vld [vmem:[%s740_s5 + $0x38] sm:$0xff]  }
   0x7   :  { %465 = vmatmul.mubr.msk.bf16.vlgmr.msra.gmra.mrb[0].mxu0 %vm128_vm0, %v110_v8  ;;  %477 = vmatpush3.bf16.msra.mxu1 %v545_v10  ;;  %v112_v17 = vpack.c.bf16 %v109_v16, %v109_v16  ;;  %v546_v18 = vld [vmem:[%s740_s5] sm:$0xff]  }
   0x8   :  { %468 = vmatprep.mubr.msk.bf16.mxu0 %vm557_vm1, %v556_v4  ;;  %518 = vmatprep.subr.bf16.mxu1 %v556_v4  ;;  %v550_v22 = vld [vmem:[%s740_s5 + $0x20] sm:$0xff]  }
   0x9   :  { %491 = vmatpush3.bf16.msra.mxu0 %v546_v18  ;;  %v425_v6 = vld [vmem:[%s741_s4] ss:$0 sm:$0xff] }
   0xa   :  { %540 = vset.pattern.permute.xlu1 %v555_v1  ;;  %41 = vperm.xlu0 %538, %v29_v9  }
   0xb   :  { %44 = vperm.xlu1 %540, %v30_v11   ;;  %492 = vmatprep.subr.bf16.mxu0 %v556_v4 }
   0xd   :  { %493 = vmatpush3.bf16.msra.mxu0 %v547_v19 }
   0xe   :  { %541 = vset.pattern.permute.xlu0 %v554_v0  ;;  %494 = vmatprep.subr.bf16.mxu0 %v556_v4 }
   0xf   :  { %542 = vset.pattern.permute.xlu1 %v554_v0  ;;  %74 = vperm.xlu0 %541, %v29_v9  }
  0x10   :  { %77 = vperm.xlu1 %542, %v30_v11   ;;  %469 = vmatmul.mubr.msk.bf16.gmra.mrb[4].mxu0 %vm128_vm0, %v111_v14 }
  0x11   :  { %472 = vmatprep.mubr.msk.bf16.mxu0 %vm557_vm1, %v556_v4  ;;  %495 = vmatpush3.bf16.msra.mxu0 %v548_v20 }
  0x12   :  { %496 = vmatprep.subr.bf16.mxu0 %v556_v4 }
  0x13   :  { %80 = vperm.xlu0 %541, %v31_v15  }
  0x14   :  { %543 = vset.pattern.permute.xlu1 %v555_v1 }
  0x15   :  { %47 = vperm.xlu1 %543, %v31_v15   ;;  %497 = vmatpush3.bf16.msra.mxu0 %v549_v21 }
  0x16   :  { %498 = vmatprep.subr.bf16.mxu0 %v556_v4 }
  0x18   :  { %473 = vmatmul.mubr.msk.bf16.gmra.mrb[8].mxu0 %vm128_vm0, %v112_v17 }
  0x19   :  { %506 = vmatprep.mubr.msk.bf16.mxu0 %vm557_vm1, %v556_v4  ;;  %499 = vmatpush3.bf16.msra.mxu0 %v550_v22 }
  0x1a   :  { %500 = vmatprep.subr.bf16.mxu0 %v556_v4 }
  0x1d   :  { %501 = vmatpush3.bf16.msra.mxu0 %v551_v23 }
  0x1e   :  { %502 = vmatprep.subr.bf16.mxu0 %v556_v4 }
  0x21   :  { %503 = vmatpush3.bf16.msra.mxu0 %v552_v58 }
  0x22   :  { %504 = vmatprep.subr.bf16.mxu0 %v556_v4 }
  0x25   :  { %505 = vmatpush3.bf16.msra.mxu0 %v553_v60 }
  0x81   :  { %v69_v26 = vpop.permute.xlu1 %68  ;;  %v36_v27 = vpop.permute.xlu0 %35 }
  0x82   :  { %vm82_vm2 = vcmp.eq.s32.totalorder %v33_v25, %v69_v26  ;;  %vm49_vm3 = vcmp.eq.s32.totalorder %v33_v25, %v36_v27 }
  0x83   :  { %v420_v30 = vsel %vm82_vm2, 1.0, %v556_v4  ;;  %v415_v31 = vsel %vm49_vm3, 1.0, %v556_v4 }
  0x85   :  { %v72_v28 = vpop.permute.xlu1 %71  ;;  %v39_v29 = vpop.permute.xlu0 %38 }
  0x86   :  { %vm83_vm4 = vcmp.eq.s32.totalorder %v33_v25, %v72_v28  ;;  %vm50_vm5 = vcmp.eq.s32.totalorder %v33_v25, %v39_v29 }
  0x87   :  { %v421_v32 = vsel %vm83_vm4, 1.0, %v556_v4  ;;  %v416_v33 = vsel %vm50_vm5, 1.0, %v556_v4 }
  0x88   :  { %v97_v34 = vpack.c.bf16 %v421_v32, %v420_v30  ;;  %v64_v35 = vpack.c.bf16 %v416_v33, %v415_v31 }
  0x89   :  { %v42_v36 = vpop.permute.xlu0 %41 }
  0x8a   :  { %v100_v37 = vadd.bf16 %v97_v34, %v64_v35  ;;  %v45_v38 = vpop.permute.xlu1 %44  ;;  %vm51_vm6 = vcmp.eq.s32.totalorder %v33_v25, %v42_v36 }
  0x8b   :  { %vm52_vm7 = vcmp.eq.s32.totalorder %v33_v25, %v45_v38  ;;  %v417_v40 = vsel %vm51_vm6, 1.0, %v556_v4 }
  0x8c   :  { %479 = vmatmul.mubr.msk.bf16.vlgmr.msra.gmra.mrb[0].mxu1 %vm128_vm0, %v100_v37  ;;  %v418_v41 = vsel %vm52_vm7, 1.0, %v556_v4  ;;  %v434_v37 = vld [vmem:[%s742_s6] ss:$0 sm:$0xff] }
  0x8d   :  { %482 = vmatprep.mubr.msk.bf16.mxu1 %vm557_vm1, %v556_v4  ;;  %526 = vmatpush3.bf16.msra.mxu1 %v546_v18  ;;  %v65_v45 = vpack.c.bf16 %v418_v41, %v417_v40 }
  0x8e   :  { %v75_v39 = vpop.permute.xlu0 %74  ;;  %519 = vmatprep.subr.bf16.mxu1 %v556_v4 }
  0x8f   :  { %vm84_vm8 = vcmp.eq.s32.totalorder %v33_v25, %v75_v39  ;;  %v78_v42 = vpop.permute.xlu1 %77 }
  0x90   :  { %v422_v43 = vsel %vm84_vm8, 1.0, %v556_v4  ;;  %vm85_vm9 = vcmp.eq.s32.totalorder %v33_v25, %v78_v42 }
  0x91   :  { %v423_v44 = vsel %vm85_vm9, 1.0, %v556_v4  ;;  %527 = vmatpush3.bf16.msra.mxu1 %v547_v19 }
  0x92   :  { %v98_v46 = vpack.c.bf16 %v423_v44, %v422_v43  ;;  %v81_v47 = vpop.permute.xlu0 %80  ;;  %520 = vmatprep.subr.bf16.mxu1 %v556_v4 }
  0x93   :  { %vm86_vm10 = vcmp.eq.s32.totalorder %v33_v25, %v81_v47 }
  0x94   :  { %v101_v48 = vadd.bf16 %v98_v46, %v65_v45  ;;  %v48_v49 = vpop.permute.xlu1 %47  ;;  %v424_v51 = vsel %vm86_vm10, 1.0, %v556_v4 }
  0x95   :  { %vm53_vm11 = vcmp.eq.s32.totalorder %v33_v25, %v48_v49  ;;  %528 = vmatpush3.bf16.msra.mxu1 %v548_v20  ;;  %v99_v53 = vpack.c.bf16 %v424_v51, %v424_v51 }
  0x96   :  { %v419_v50 = vsel %vm53_vm11, 1.0, %v556_v4  ;;  %483 = vmatmul.mubr.msk.bf16.gmra.mrb[4].mxu1 %vm128_vm0, %v101_v48  ;;  %521 = vmatprep.subr.bf16.mxu1 %v556_v4 }
  0x97   :  { %486 = vmatprep.mubr.msk.bf16.mxu1 %vm557_vm1, %v556_v4  ;;  %v66_v52 = vpack.c.bf16 %v419_v50, %v419_v50 }
  0x99   :  { %529 = vmatpush3.bf16.msra.mxu1 %v549_v21  ;;  %v102_v54 = vadd.bf16 %v99_v53, %v66_v52 }
  0x9a   :  { %522 = vmatprep.subr.bf16.mxu1 %v556_v4 }
  0x9d   :  { %530 = vmatpush3.bf16.msra.mxu1 %v550_v22 }
  0x9e   :  { %487 = vmatmul.mubr.msk.bf16.gmra.mrb[8].mxu1 %vm128_vm0, %v102_v54  ;;  %523 = vmatprep.subr.bf16.mxu1 %v556_v4 }
  0x9f   :  { %510 = vmatprep.mubr.msk.bf16.mxu1 %vm557_vm1, %v556_v4 }
  0xa1   :  { %531 = vmatpush3.bf16.msra.mxu1 %v551_v23 }
  0xa2   :  { %524 = vmatprep.subr.bf16.mxu1 %v556_v4 }
  0xa5   :  { %532 = vmatpush3.bf16.msra.mxu1 %v552_v58 }
  0xa6   :  { %525 = vmatprep.subr.bf16.mxu1 %v556_v4 }
  0xa9   :  { %533 = vmatpush3.bf16.msra.mxu1 %v553_v60 }
  0xda   :  { %v172_v55 = vpop.f32.mrb[0].mxu0 }
  0xdb   :  { %v466_v56 = vpop.f32.mrb[1].mxu0  ;;  %v173_v7 = vadd.f32 %v425_v6, %v172_v55 }
  0xdc   :  { %v175_v57 = vpop.f32.mrb[2].mxu0 }
  0xdd   :  { %v467_v59 = vpop.f32.mrb[3].mxu0  ;;  %v176_v8 = vadd.f32 %v425_v6, %v175_v57  ;;  %v194_v9 = vmax.f32 %v173_v7, 0.0 }
  0xdf   :  { %v195_v10 = vmax.f32 %v176_v8, 0.0 }
  0xe3   :  { %v180_v61 = vpop.f32.mrb[4].mxu0 }
  0xe4   :  { %v470_v62 = vpop.f32.mrb[5].mxu0  ;;  %v181_v16 = vadd.f32 %v425_v6, %v180_v61 }
  0xe5   :  { %v183_v63 = vpop.f32.mrb[6].mxu0 }
  0xe6   :  { %v471_v0 = vpop.f32.mrb[7].mxu0  ;;  %v196_v19 = vmax.f32 %v181_v16, 0.0  ;;  %v184_v20 = vadd.f32 %v425_v6, %v183_v63 }
  0xe8   :  { %v197_v22 = vmax.f32 %v184_v20, 0.0 }
  0xeb   :  { %v188_v1 = vpop.f32.mrb[8].mxu0 }
  0xec   :  { %v474_v2 = vpop.f32.mrb[9].mxu0  ;;  %v189_v25 = vadd.f32 %v425_v6, %v188_v1 }
  0xed   :  { %v191_v3 = vpop.f32.mrb[10].mxu0 }
  0xee   :  { %v475_v5 = vpop.f32.mrb[11].mxu0  ;;  %v198_v30 = vmax.f32 %v189_v25, 0.0 }
 0x15f   :  { %v248_v11 = vpop.f32.mrb[0].mxu1 }
 0x160   :  { %v249_v12 = vadd.f32 %v248_v11, %v194_v9  ;;  %v480_v13 = vpop.f32.mrb[1].mxu1 }
 0x161   :  { %v251_v14 = vpop.f32.mrb[2].mxu1 }
 0x162   :  { %v252_v15 = vadd.f32 %v251_v14, %v195_v10  ;;  %v481_v17 = vpop.f32.mrb[3].mxu1 }
 0x164   :  { %v270_v18 = vpack.c.bf16 %v252_v15, %v249_v12 }
 0x166   :  { %507 = vmatmul.mubr.bf16.vlgmr.msra.gmra.mrb[12].mxu0 %v270_v18 }
 0x169   :  { %v256_v21 = vpop.f32.mrb[4].mxu1 }
 0x16a   :  { %v257_v23 = vadd.f32 %v256_v21, %v196_v19  ;;  %v484_v24 = vpop.f32.mrb[5].mxu1 }
 0x16b   :  { %v259_v26 = vpop.f32.mrb[6].mxu1 }
 0x16c   :  { %v260_v27 = vadd.f32 %v259_v26, %v197_v22  ;;  %v485_v28 = vpop.f32.mrb[7].mxu1 }
 0x16e   :  { %v271_v29 = vpack.c.bf16 %v260_v27, %v257_v23 }
 0x170   :  { %511 = vmatmul.mubr.bf16.vlgmr.msra.gmra.mrb[12].mxu1 %v271_v29 }
 0x171   :  { %v264_v31 = vpop.f32.mrb[8].mxu1  ;;  %514 = vmatprep.mubr.msk.bf16.mxu1 %vm557_vm1, %v556_v4 }
 0x172   :  { %v265_v32 = vadd.f32 %v264_v31, %v198_v30  ;;  %v488_v33 = vpop.f32.mrb[9].mxu1 }
 0x173   :  { %v267_v34 = vpop.f32.mrb[10].mxu1 }
 0x174   :  { %v489_v35 = vpop.f32.mrb[11].mxu1  ;;  %v272_v36 = vpack.c.bf16 %v265_v32, %v265_v32 }
 0x178   :  { %515 = vmatmul.mubr.bf16.gmra.mrb[16].mxu1 %v272_v36 }
 0x239   :  { %v378_v38 = vpop.f32.mrb[12].mxu0 }
 0x23a   :  { %v379_v39 = vadd.f32 %v434_v37, %v378_v38  ;;  %v508_v40 = vpop.f32.mrb[13].mxu0 }
 0x23b   :  { %v381_v41 = vpop.f32.mrb[14].mxu0 }
 0x23c   :  { %v400_v42 = vmax.f32 %v379_v39, 0.0  ;;  %v382_v43 = vadd.f32 %v434_v37, %v381_v41  ;;  %v509_v44 = vpop.f32.mrb[15].mxu0 }
 0x23e   :  { %406 = vst.msk [vmem:[%s743_s7] sm:$0xff] %vm405_vm12, %v400_v42  ;;  %v401_v4 = vmax.f32 %v382_v43, 0.0 }
 0x240   :  { %407 = vst.msk [vmem:[%s743_s7 + $0x8] sm:$0xff] %vm405_vm12, %v401_v4 }
 0x243   :  { %v386_v45 = vpop.f32.mrb[12].mxu1 }
 0x244   :  { %v387_v46 = vadd.f32 %v434_v37, %v386_v45  ;;  %v512_v47 = vpop.f32.mrb[13].mxu1 }
 0x245   :  { %v389_v48 = vpop.f32.mrb[14].mxu1 }
 0x246   :  { %v402_v49 = vmax.f32 %v387_v46, 0.0  ;;  %v390_v50 = vadd.f32 %v434_v37, %v389_v48  ;;  %v513_v51 = vpop.f32.mrb[15].mxu1 }
 0x248   :  { %408 = vst.msk [vmem:[%s743_s7 + $0x10] sm:$0xff] %vm405_vm12, %v402_v49  ;;  %v403_v52 = vmax.f32 %v390_v50, 0.0 }
 0x24a   :  { %409 = vst.msk [vmem:[%s743_s7 + $0x18] sm:$0xff] %vm405_vm12, %v403_v52 }
 0x24b   :  { %v394_v53 = vpop.f32.mrb[16].mxu1 }
 0x24c   :  { %v395_v54 = vadd.f32 %v434_v37, %v394_v53  ;;  %v516_v55 = vpop.f32.mrb[17].mxu1 }
 0x24d   :  { %v397_v56 = vpop.f32.mrb[18].mxu1 }
 0x24e   :  { %v404_v57 = vmax.f32 %v395_v54, 0.0  ;;  %v517_v58 = vpop.f32.mrb[19].mxu1 }
 0x250   :  { %410 = vst.msk [vmem:[%s743_s7 + $0x20] sm:$0xff] %vm405_vm12, %v404_v57 }

</bundles_post_ra>
